<compile_context>
chip_gen: v7x
topology: tpu7x:2x2x1
jax: 0.10.0
libtpu: 0.0.40
codegen_flags: <defaults>
</compile_context>

<pallas_src>
import functools

import jax
import jax.numpy as jnp
from jax.experimental import pallas as pl
from jax.experimental.pallas import tpu as pltpu


# dot_general dimension numbers: contract the last dim of both operands (A @ B^T)
_NT = (((1,), (1,)), ((), ()))


def _round_up(x, m):
    return ((x + m - 1) // m) * m


def _pick_node_tile(n_pad, cap=512):
    t = min(cap, n_pad)
    while n_pad % t != 0:
        t //= 2
    return max(t, 128)


def _split_hi_lo(v):
    """Split f32 -> (hi, lo) bf16 with hi + lo ~= v (~2^-17 relative error).

    Multiplying both halves against an exact 0/1 one-hot on the MXU (f32
    accumulate) and summing the two results reproduces the f32 gather/scatter
    to ~1e-5 relative accuracy without any tile-sized f32 converts.
    """
    hi = v.astype(jnp.bfloat16)
    lo = (v - hi.astype(jnp.float32)).astype(jnp.bfloat16)
    return hi, lo


# ---------------------------------------------------------------------------
# Kernel 1: projection (node-parallel).  h = x @ W and per-node attention
# scalars a_src = a1.h, a_dst = a2.h in lane-dense [H, N] layout.
# ---------------------------------------------------------------------------
def gat_project_kernel(x_ref, w_ref, a1t_ref, a2t_ref,
                       h_ref, asrc_ref, adst_ref):
    h = jnp.dot(x_ref[...], w_ref[...], preferred_element_type=jnp.float32)
    h_ref[...] = h
    asrc_ref[...] = jax.lax.dot_general(a1t_ref[...], h, _NT,
                                        preferred_element_type=jnp.float32)
    adst_ref[...] = jax.lax.dot_general(a2t_ref[...], h, _NT,
                                        preferred_element_type=jnp.float32)


# ---------------------------------------------------------------------------
# Kernel 2: edge phase.  grid = (2, E_tiles)
#   axis 0 = pass (0: accumulate softmax denominators, 1: accumulate S)
#   axis 1 = edge-tile reduction ("arbitrary", accumulators resident in VMEM)
# Only the small [*, N_pad] tables are resident; the bf16 one-hot tiles stream.
# ---------------------------------------------------------------------------
def gat_edge_kernel(asrcT_ref, adstT_ref, src_oh_ref, dst_oh_ref,
                    s_ref,
                    stab_ref, dtab_ref, dentab_ref, den_ref, *opt_scratch,
                    heads, negative_slope, tile_e, num_edges, mask_tail,
                    cache_p):
    H = heads
    phase = pl.program_id(0)
    et = pl.program_id(1)
    p_sc = opt_scratch[0] if cache_p else None

    # ---- one-time init at the start of pass 0 ------------------------------
    @pl.when((phase == 0) & (et == 0))
    def _init_pass0():
        a_srcT = asrcT_ref[...]                                   # [H, Np] f32
        a_dstT = adstT_ref[...]
        # Softmax is invariant to any per-group shift; use the cheap upper
        # bound leaky_relu(a_src[i] + max_j a_dst[j]) -> exp(.) <= 1, no
        # grouped max needed.
        shift = a_srcT + jnp.max(a_dstT, axis=1, keepdims=True)
        shift = jnp.maximum(shift, negative_slope * shift)        # LeakyReLU
        ah, al = _split_hi_lo(a_srcT)
        th, tl = _split_hi_lo(shift)
        stab_ref[...] = jnp.concatenate([ah, al, th, tl], axis=0)   # [4H, Np]
        dh, dl = _split_hi_lo(a_dstT)
        dtab_ref[...] = jnp.concatenate([dh, dl], axis=0)           # [2H, Np]
        den_ref[...] = jnp.zeros_like(den_ref)

    # ---- one-time init at the start of pass 1 ------------------------------
    @pl.when((phase == 1) & (et == 0))
    def _init_pass1():
        dh, dl = _split_hi_lo(den_ref[...])
        dentab_ref[...] = jnp.concatenate([dh, dl], axis=0)         # [2H, Np]
        s_ref[...] = jnp.zeros_like(s_ref)

    src_oh = src_oh_ref[...]                                  # bf16 [TE, Np]
    dst_oh = dst_oh_ref[...]                                  # bf16 [TE, Np]

    def _edge_p():
        # gather per-node scalars to edges: pure bf16 MXU matmuls.
        g = jax.lax.dot_general(stab_ref[...], src_oh, _NT,
                                preferred_element_type=jnp.float32)  # [4H, TE]
        a_src_e = g[0:H] + g[H:2 * H]
        shift_e = g[2 * H:3 * H] + g[3 * H:4 * H]
        gd = jax.lax.dot_general(dtab_ref[...], dst_oh, _NT,
                                 preferred_element_type=jnp.float32)  # [2H, TE]
        a_dst_e = gd[0:H] + gd[H:2 * H]
        e = a_src_e + a_dst_e
        e = jnp.maximum(e, negative_slope * e)                    # LeakyReLU
        p = jnp.exp(e - shift_e)                                  # <= ~1
        if mask_tail:
            eid = et * tile_e + jax.lax.broadcasted_iota(jnp.int32, p.shape, 1)
            p = jnp.where(eid < num_edges, p, 0.0)                # padded edges
        return p

    @pl.when(phase == 0)
    def _pass0():
        p = _edge_p()                                             # [H, TE] f32
        if cache_p:
            off = pl.multiple_of(et * tile_e, tile_e)
            p_sc[:, pl.ds(off, tile_e)] = p
        ph, plo = _split_hi_lo(p)
        sc = jnp.dot(jnp.concatenate([ph, plo], axis=0), src_oh,
                     preferred_element_type=jnp.float32)          # [2H, Np]
        den_ref[...] = den_ref[...] + sc[0:H] + sc[H:2 * H]

    @pl.when(phase == 1)
    def _pass1():
        g = jax.lax.dot_general(dentab_ref[...], src_oh, _NT,
                                preferred_element_type=jnp.float32)  # [2H, TE]
        den_e = g[0:H] + g[H:2 * H] + 1e-16
        inv = pl.reciprocal(den_e, approx=True)                   # EUP slot
        inv = inv * (2.0 - den_e * inv)                           # Newton -> ~f32
        if cache_p:
            off = pl.multiple_of(et * tile_e, tile_e)
            p = p_sc[:, pl.ds(off, tile_e)]
        else:
            p = _edge_p()
        # TODO(synk): attention dropout is identity here (module default p=0).
        alpha = p * inv
        ah, al = _split_hi_lo(alpha)
        sc = jnp.dot(jnp.concatenate([ah, al], axis=0), dst_oh,
                     preferred_element_type=jnp.float32)          # [2H, Np]
        s_ref[...] = s_ref[...] + sc[0:H] + sc[H:2 * H]


# ---------------------------------------------------------------------------
# Kernel 3: finalize.  out = h * S(head-expanded) + bias
# grid = (N_tiles,), "parallel"; lane-dense 128-wide padded output; S fed as
# lane-dense (H, TN) blocks (no host-side transpose).
# ---------------------------------------------------------------------------
def gat_finalize_kernel(h_ref, s_ref, hsel_ref, bias_ref, out_ref, *, heads):
    st = jnp.transpose(s_ref[...], (1, 0))                        # [TN, H]
    h = h_ref[...]                                                # [TN, HCp]
    sfull = jnp.zeros_like(h)
    for hd in range(heads):         # static unroll, VPU broadcasts (no matmul)
        sfull = sfull + st[:, hd:hd + 1] * hsel_ref[hd:hd + 1, :]
    out_ref[...] = h * sfull + bias_ref[...]


# ---------------------------------------------------------------------------
# Wrapper: self loops, one-hot edge matrices, generation-aware tiling,
# param packing + three pallas_calls.
# ---------------------------------------------------------------------------
def gat_conv(x, edge_index, weight, att, bias, *, heads, out_channels,
             negative_slope=0.2):
    x = x.astype(jnp.float32)
    weight = weight.astype(jnp.float32)
    N, F_in = x.shape
    H, C = heads, out_channels
    HC = H * C

    # self loops appended (matches add_self_loops)
    loop = jnp.arange(N, dtype=edge_index.dtype)
    ei = jnp.concatenate([edge_index, jnp.stack([loop, loop])], axis=1)
    E = ei.shape[1]

    N_pad = _round_up(max(N, 128), 128)
    HC_pad = _round_up(max(HC, 128), 128)

    # ---- generation-aware VMEM / tile sizing -------------------------------
    try:
        vmem_cap = int(getattr(pltpu.get_tpu_info(), "vmem_capacity_bytes",
                               128 << 20))
    except Exception:
        vmem_cap = 128 << 20
    small_vmem = vmem_cap <= (64 << 20)            # v7x-class (64 MiB) parts
    stream_budget = (24 << 20) if small_vmem else (80 << 20)
    vmem_cap_limit = (48 << 20) if small_vmem else (100 << 20)

    TILE_E = 512 if small_vmem else 1024
    while TILE_E > 128 and (TILE_E // 2 >= _round_up(E, 128)
                            or 2 * 2 * TILE_E * N_pad * 2 > stream_budget):
        TILE_E //= 2
    # TODO(synk): if even [128, N_pad] bf16 tiles exceed the stream budget
    # (N_pad >= ~32k on v7x), add an N-tile grid axis or switch to the sparse
    # scalar-prefetch gather/scatter path.
    E_pad = _round_up(E, TILE_E)
    n_et = E_pad // TILE_E
    n_buf = 3 if (not small_vmem and n_et >= 3
                  and 2 * 3 * TILE_E * N_pad * 2 <= stream_budget) else 2

    p_cache_bytes = max(H, 8) * E_pad * 4
    cache_p = p_cache_bytes <= ((4 << 20) if small_vmem else (16 << 20))

    # ---- dense one-hot edge matrices in bf16 (0/1 exact; halves HBM bytes) --
    # Padded edges use an out-of-range index -> all-zero rows.
    pad_e = E_pad - E
    src_p = jnp.concatenate([ei[0], jnp.full((pad_e,), N_pad, ei.dtype)])
    dst_p = jnp.concatenate([ei[1], jnp.full((pad_e,), N_pad, ei.dtype)])
    A_src = jax.nn.one_hot(src_p, N_pad, dtype=jnp.bfloat16)     # [E_pad, N_pad]
    A_dst = jax.nn.one_hot(dst_p, N_pad, dtype=jnp.bfloat16)     # [E_pad, N_pad]

    # ---- padded parameters (zero-padded -> padded rows/cols are exactly 0) --
    x_p = jnp.zeros((N_pad, F_in), jnp.float32).at[:N, :].set(x)
    w_p = jnp.zeros((F_in, HC_pad), jnp.float32).at[:, :HC].set(weight)
    att_hc = att.reshape(H, 2 * C).astype(jnp.float32)
    a1t = jnp.zeros((H, HC_pad), jnp.float32)    # source-role attention vector
    a2t = jnp.zeros((H, HC_pad), jnp.float32)    # dest-role attention vector
    hsel = jnp.zeros((H, HC_pad), jnp.float32)   # head -> channel selector
    for hd in range(H):
        a1t = a1t.at[hd, hd * C:(hd + 1) * C].set(att_hc[hd, :C])
        a2t = a2t.at[hd, hd * C:(hd + 1) * C].set(att_hc[hd, C:])
        hsel = hsel.at[hd, hd * C:(hd + 1) * C].set(1.0)
    bias_p = jnp.zeros((1, HC_pad), jnp.float32).at[0, :HC].set(
        bias.astype(jnp.float32))

    # ---- kernel 1: projection (node-parallel) -------------------------------
    TNP = _pick_node_tile(N_pad)
    h_out, a_srcT, a_dstT = pl.pallas_call(
        gat_project_kernel,
        out_shape=(jax.ShapeDtypeStruct((N_pad, HC_pad), jnp.float32),
                   jax.ShapeDtypeStruct((H, N_pad), jnp.float32),
                   jax.ShapeDtypeStruct((H, N_pad), jnp.float32)),
        grid=(N_pad // TNP,),
        in_specs=[
            pl.BlockSpec((TNP, F_in), lambda i: (i, 0)),         # x tile
            pl.BlockSpec((F_in, HC_pad), lambda i: (0, 0)),      # W
            pl.BlockSpec((H, HC_pad), lambda i: (0, 0)),         # a_i^T
            pl.BlockSpec((H, HC_pad), lambda i: (0, 0)),         # a_j^T
        ],
        out_specs=(pl.BlockSpec((TNP, HC_pad), lambda i: (i, 0)),
                   pl.BlockSpec((H, TNP), lambda i: (0, i)),
                   pl.BlockSpec((H, TNP), lambda i: (0, i))),
        compiler_params=pltpu.CompilerParams(
            dimension_semantics=("parallel",)),
    )(x_p, w_p, a1t, a2t)

    # ---- kernel 2: edge phase (2 passes x E tiles) ---------------------------
    def _stream_spec():
        idx = lambda ph, e: (e, 0)
        if n_buf > 2:
            try:
                return pl.BlockSpec((TILE_E, N_pad), idx,
                                    pipeline_mode=pl.Buffered(n_buf))
            except TypeError:
                pass
        return pl.BlockSpec((TILE_E, N_pad), idx)

    tab_bytes = (8 * H) * N_pad * 2 + H * N_pad * 4
    resident_bytes = 2 * (2 * H * N_pad * 4) + 2 * (H * N_pad * 4) + tab_bytes
    if cache_p:
        resident_bytes += p_cache_bytes
    stream_bytes = 2 * n_buf * TILE_E * N_pad * 2
    vmem_bytes = int(min(max(2 * (resident_bytes + stream_bytes) + (8 << 20),
                             32 << 20), vmem_cap_limit))
    cost = pl.CostEstimate(
        flops=int(2 * 2 * 8 * H * E_pad * N_pad),
        transcendentals=int(2 * H * E_pad),
        bytes_accessed=int(2 * 2 * E_pad * N_pad * 2 + 6 * H * N_pad * 4))

    scratch = [pltpu.VMEM((4 * H, N_pad), jnp.bfloat16),   # a_src hi/lo, shift hi/lo
               pltpu.VMEM((2 * H, N_pad), jnp.bfloat16),   # a_dst hi/lo
               pltpu.VMEM((2 * H, N_pad), jnp.bfloat16),   # denom hi/lo (pass 1)
               pltpu.VMEM((H, N_pad), jnp.float32)]        # denom accumulator
    if cache_p:
        scratch.append(pltpu.VMEM((H, E_pad), jnp.float32))   # cached p

    edge_kernel = functools.partial(
        gat_edge_kernel, heads=H, negative_slope=negative_slope,
        tile_e=TILE_E, num_edges=E, mask_tail=(E_pad > E), cache_p=cache_p)

    s_out = pl.pallas_call(
        edge_kernel,
        out_shape=jax.ShapeDtypeStruct((H, N_pad), jnp.float32),
        grid=(2, n_et),
        in_specs=[
            pl.BlockSpec((H, N_pad), lambda ph, e: (0, 0)),      # a_src^T (resident)
            pl.BlockSpec((H, N_pad), lambda ph, e: (0, 0)),      # a_dst^T (resident)
            _stream_spec(),                                      # A_src tile (bf16)
            _stream_spec(),                                      # A_dst tile (bf16)
        ],
        out_specs=pl.BlockSpec((H, N_pad), lambda ph, e: (0, 0)),
        scratch_shapes=scratch,
        compiler_params=pltpu.CompilerParams(
            dimension_semantics=("arbitrary", "arbitrary"),
            vmem_limit_bytes=vmem_bytes),
        cost_estimate=cost,
    )(a_srcT, a_dstT, A_src, A_dst)

    # ---- kernel 3: finalize (node-parallel, lane-dense output) --------------
    TNF = _pick_node_tile(N_pad)
    fin_kernel = functools.partial(gat_finalize_kernel, heads=H)
    out_p = pl.pallas_call(
        fin_kernel,
        out_shape=jax.ShapeDtypeStruct((N_pad, HC_pad), jnp.float32),
        grid=(N_pad // TNF,),
        in_specs=[
            pl.BlockSpec((TNF, HC_pad), lambda i: (i, 0)),       # h tile
            pl.BlockSpec((H, TNF), lambda i: (0, i)),            # S (lane-dense)
            pl.BlockSpec((H, HC_pad), lambda i: (0, 0)),         # head selector
            pl.BlockSpec((1, HC_pad), lambda i: (0, 0)),         # bias
        ],
        out_specs=pl.BlockSpec((TNF, HC_pad), lambda i: (i, 0)),
        compiler_params=pltpu.CompilerParams(
            dimension_semantics=("parallel",)),
    )(h_out, s_out, hsel, bias_p)

    return out_p[:N, :HC]


# ---------------------------------------------------------------------------
# Pure-JAX reference (mirrors the PyTorch module line by line) for validation
# ---------------------------------------------------------------------------
def gat_ref(x, edge_index, weight, att, bias, *, heads, out_channels,
            negative_slope=0.2):
    N = x.shape[0]
    H, C = heads, out_channels
    loop = jnp.arange(N, dtype=edge_index.dtype)
    ei = jnp.concatenate([edge_index, jnp.stack([loop, loop])], axis=1)
    h = (x @ weight).reshape(N, H, C)
    x_i = h[ei[0]]
    x_j = h[ei[1]]
    alpha = (jnp.concatenate([x_i, x_j], axis=-1) * att.reshape(1, H, 2 * C)).sum(-1)
    alpha = jnp.where(alpha > 0, alpha, negative_slope * alpha)
    gmax = jax.ops.segment_max(alpha, ei[0], num_segments=N)
    alpha = jnp.exp(alpha - gmax[ei[0]])
    denom = jax.ops.segment_sum(alpha, ei[0], num_segments=N)
    alpha = alpha / (denom[ei[0]] + 1e-16)
    msg = x_j * alpha[:, :, None]
    out = jax.ops.segment_sum(msg, ei[1], num_segments=N)
    return out.reshape(N, H * C) + bias


def glorot(key, shape):
    std = (6.0 / (shape[-2] + shape[-1])) ** 0.5
    return jax.random.uniform(key, shape, jnp.float32, -std, std)


if __name__ == "__main__":
    N, F_IN, C, H = 8, 16, 8, 2

    key = jax.random.PRNGKey(0)
    kx, kw, ka = jax.random.split(key, 3)
    x = jax.random.normal(kx, (N, F_IN), jnp.float32)
    weight = glorot(kw, (F_IN, H * C))            # [in_channels, heads*out_channels]
    att = glorot(ka, (1, H, 2 * C))               # [1, heads, 2*out_channels]
    bias = jnp.zeros((H * C,), jnp.float32)       # concat=True bias

    src = jnp.array([0, 1, 2, 3, 4, 5, 6, 7, 0, 2, 4, 6], jnp.int32)
    dst = jnp.array([1, 2, 3, 4, 5, 6, 7, 0, 3, 5, 7, 1], jnp.int32)
    edge_index = jnp.stack([src, dst])            # [2, E0]

    out = gat_conv(x, edge_index, weight, att, bias,
                   heads=H, out_channels=C)
    out = jax.block_until_ready(out)

    ref = gat_ref(x, edge_index, weight, att, bias,
                  heads=H, out_channels=C)
    assert out.shape == (N, H * C)
    assert jnp.allclose(out, ref, rtol=1e-4, atol=1e-4), (
        f"max abs err {jnp.max(jnp.abs(out - ref))}")

    print("KERNEL_OK")
</pallas_src>

<mosaic_0001>
module attributes {stable_mosaic.version = 11 : i64} {
  func.func @gat_project_kernel(%arg0: i32, %arg1: memref<128x16xf32, #tpu.memory_space<vmem>>, %arg2: memref<16x128xf32, #tpu.memory_space<vmem>>, %arg3: memref<2x128xf32, #tpu.memory_space<vmem>>, %arg4: memref<2x128xf32, #tpu.memory_space<vmem>>, %arg5: memref<128x128xf32, #tpu.memory_space<vmem>>, %arg6: memref<2x128xf32, #tpu.memory_space<vmem>>, %arg7: memref<2x128xf32, #tpu.memory_space<vmem>>) attributes {dimension_semantics = [#tpu.dimension_semantics<parallel>], iteration_bounds = array<i64: 1>, scalar_prefetch = 0 : i64, scratch_operands = 0 : i64, tpu.core_type = #tpu.core_type<tc>, window_params = [{transform_indices = @transform_0, window_bounds = array<i64: 128, 16>}, {pipeline_mode = #tpu.pipeline_mode<synchronous>, transform_indices = @transform_1, window_bounds = array<i64: 16, 128>}, {pipeline_mode = #tpu.pipeline_mode<synchronous>, transform_indices = @transform_2, window_bounds = array<i64: 2, 128>}, {pipeline_mode = #tpu.pipeline_mode<synchronous>, transform_indices = @transform_3, window_bounds = array<i64: 2, 128>}, {transform_indices = @transform_4, window_bounds = array<i64: 128, 128>}, {transform_indices = @transform_5, window_bounds = array<i64: 2, 128>}, {transform_indices = @transform_6, window_bounds = array<i64: 2, 128>}]} {
    %c0 = arith.constant 0 : index
    %c0_0 = arith.constant 0 : index
    %0 = vector.load %arg1[%c0, %c0_0] : memref<128x16xf32, #tpu.memory_space<vmem>>, vector<128x16xf32>
    %c0_1 = arith.constant 0 : index
    %c0_2 = arith.constant 0 : index
    %1 = vector.load %arg2[%c0_1, %c0_2] : memref<16x128xf32, #tpu.memory_space<vmem>>, vector<16x128xf32>
    %cst = arith.constant dense<0.000000e+00> : vector<128x128xf32>
    %2 = tpu.matmul %0, %1, %cst {dimension_numbers = #tpu.dot_dimension_numbers<[1], [0], [0], [1], [0, 0, 1, 1], [], []>} : vector<128x16xf32>, vector<16x128xf32>, vector<128x128xf32> -> vector<128x128xf32>
    %c0_3 = arith.constant 0 : index
    %c0_4 = arith.constant 0 : index
    %3 = vector.load %arg5[%c0_3, %c0_4] : memref<128x128xf32, #tpu.memory_space<vmem>>, vector<128x128xf32>
    tpu.vector_store %arg5[%c0_3, %c0_4], %2 {strides = array<i32>} : memref<128x128xf32, #tpu.memory_space<vmem>>, vector<128x128xf32>,
    %c0_5 = arith.constant 0 : index
    %c0_6 = arith.constant 0 : index
    %4 = vector.load %arg3[%c0_5, %c0_6] : memref<2x128xf32, #tpu.memory_space<vmem>>, vector<2x128xf32>
    %cst_7 = arith.constant dense<0.000000e+00> : vector<2x128xf32>
    %5 = tpu.matmul %4, %2, %cst_7 {dimension_numbers = #tpu.dot_dimension_numbers<[1], [1], [0], [0], [0, 0, 1, 0], [], []>} : vector<2x128xf32>, vector<128x128xf32>, vector<2x128xf32> -> vector<2x128xf32>
    %c0_8 = arith.constant 0 : index
    %c0_9 = arith.constant 0 : index
    %6 = vector.load %arg6[%c0_8, %c0_9] : memref<2x128xf32, #tpu.memory_space<vmem>>, vector<2x128xf32>
    tpu.vector_store %arg6[%c0_8, %c0_9], %5 {strides = array<i32>} : memref<2x128xf32, #tpu.memory_space<vmem>>, vector<2x128xf32>,
    %c0_10 = arith.constant 0 : index
    %c0_11 = arith.constant 0 : index
    %7 = vector.load %arg4[%c0_10, %c0_11] : memref<2x128xf32, #tpu.memory_space<vmem>>, vector<2x128xf32>
    %cst_12 = arith.constant dense<0.000000e+00> : vector<2x128xf32>
    %8 = tpu.matmul %7, %2, %cst_12 {dimension_numbers = #tpu.dot_dimension_numbers<[1], [1], [0], [0], [0, 0, 1, 0], [], []>} : vector<2x128xf32>, vector<128x128xf32>, vector<2x128xf32> -> vector<2x128xf32>
    %c0_13 = arith.constant 0 : index
    %c0_14 = arith.constant 0 : index
    %9 = vector.load %arg7[%c0_13, %c0_14] : memref<2x128xf32, #tpu.memory_space<vmem>>, vector<2x128xf32>
    tpu.vector_store %arg7[%c0_13, %c0_14], %8 {strides = array<i32>} : memref<2x128xf32, #tpu.memory_space<vmem>>, vector<2x128xf32>,
    return
  }
  func.func @transform_0(%arg0: i32) -> (i32, i32) {
    %c0_i32 = arith.constant 0 : i32
    %c0_i32_0 = arith.constant 0 : i32
    return %arg0, %c0_i32 : i32, i32
  }
  func.func @transform_1(%arg0: i32) -> (i32, i32) {
    %c0_i32 = arith.constant 0 : i32
    %c0_i32_0 = arith.constant 0 : i32
    %c0_i32_1 = arith.constant 0 : i32
    return %c0_i32, %c0_i32_0 : i32, i32
  }
  func.func @transform_2(%arg0: i32) -> (i32, i32) {
    %c0_i32 = arith.constant 0 : i32
    %c0_i32_0 = arith.constant 0 : i32
    %c0_i32_1 = arith.constant 0 : i32
    return %c0_i32, %c0_i32_0 : i32, i32
  }
  func.func @transform_3(%arg0: i32) -> (i32, i32) {
    %c0_i32 = arith.constant 0 : i32
    %c0_i32_0 = arith.constant 0 : i32
    %c0_i32_1 = arith.constant 0 : i32
    return %c0_i32, %c0_i32_0 : i32, i32
  }
  func.func @transform_4(%arg0: i32) -> (i32, i32) {
    %c0_i32 = arith.constant 0 : i32
    %c0_i32_0 = arith.constant 0 : i32
    return %arg0, %c0_i32 : i32, i32
  }
  func.func @transform_5(%arg0: i32) -> (i32, i32) {
    %c0_i32 = arith.constant 0 : i32
    %c0_i32_0 = arith.constant 0 : i32
    return %c0_i32, %arg0 : i32, i32
  }
  func.func @transform_6(%arg0: i32) -> (i32, i32) {
    %c0_i32 = arith.constant 0 : i32
    %c0_i32_0 = arith.constant 0 : i32
    return %c0_i32, %arg0 : i32, i32
  }
}

</mosaic_0001>

<bundles_post_ra>
// kernel: tpu_custom_call.1
= control target key start
LH: loop header
LB: loop body
LE: loop exit
PB: predicated region body
PF: predicated region fallthrough
CT: control target
= control target key end

     0   :  { %12 = vsyncpa [#allocation3], 0  ;;  %vm40_vm0 = vcmask 130048   ;;  %s911_s0 = inlined_call_operand.vmem [shape: f32[128,16], index: 0, kind: input, shape index: {}]   ;;  %s912_s1 = inlined_call_operand.vmem [shape: f32[16,128], index: 1, kind: input, shape index: {}]   ;;  %s913_s2 = inlined_call_operand.vmem [shape: f32[2,128], index: 2, kind: input, shape index: {}]   ;;  %s914_s3 = inlined_call_operand.vmem [shape: f32[2,128], index: 3, kind: input, shape index: {}]   ;;  %s915_s4 = inlined_call_operand.hbm [shape: f32[128,128], index: 4, kind: output, shape index: {0}]   ;;  %s916_s5 = inlined_call_operand.hbm [shape: f32[2,128], index: 5, kind: output, shape index: {1}]   ;;  %s917_s6 = inlined_call_operand.hbm [shape: f32[2,128], index: 6, kind: output, shape index: {2}]  }
   0x1   :  { %v38_v0 = vld [vmem:[%s912_s1] sm:$0xff]  ;;  %v39_v1 = vld [vmem:[%s912_s1 + $0x8] sm:$0xff]  ;;  %v24_v5 = vld [vmem:[%s911_s0 + $0x10] sm:$0xff] }
   0x2   :  { %v22_v2 = vld [vmem:[%s911_s0] sm:$0xff]  ;;  %v603_v3 = vpack.c.bf16 %v39_v1, %v38_v0  ;;  %v23_v4 = vld [vmem:[%s911_s0 + $0x8] sm:$0xff] }
   0x3   :  { %509 = vmatprep.mubr.msk.f32.mxu0 %vm40_vm0, %v22_v2 }
   0x4   :  { %604 = vmatprep.subr.bf16.mxu0 %v603_v3 }
   0x5   :  { %606 = vmatpush3.bf16.msra.mxu0 %v603_v3 }
   0x6   :  { %13 = vsyncpa [#allocation5], 0  ;;  %v25_v6 = vld [vmem:[%s911_s0 + $0x18] sm:$0xff]  ;;  %v26_v7 = vld [vmem:[%s911_s0 + $0x20] sm:$0xff]  ;;  %v733_v19 = vmov 0.0|0.0   ;;  %vm734_vm1 = vmmov 0  }
   0x7   :  { %v27_v8 = vld [vmem:[%s911_s0 + $0x28] sm:$0xff]  ;;  %v28_v9 = vld [vmem:[%s911_s0 + $0x30] sm:$0xff]  ;;  %v29_v10 = vld [vmem:[%s911_s0 + $0x38] sm:$0xff]  ;;  %607 = vmatprep.subr.bf16.mxu1 %v733_v19  ;;  %631 = vmatprep.subr.bf16.mxu0 %v733_v19  ;;  %v735_v20 = vmov 0.0   ;;  %s736_s10 = smov [#allocation2]  }
   0x8   :  { %510 = vmatmul.mubr.msk.f32.vlgmr.msra.gmra.mrb[0].mxu0 %vm40_vm0, %v23_v4  ;;  %v30_v11 = vld [vmem:[%s911_s0 + $0x40] sm:$0xff]  ;;  %v31_v12 = vld [vmem:[%s911_s0 + $0x48] sm:$0xff]  ;;  %v32_v13 = vld [vmem:[%s911_s0 + $0x50] sm:$0xff]  ;;  %565 = vmatprep.mubr.msk.f32.mxu1 %vm734_vm1, %v735_v20  ;;  %s399_s11 = sshll.u32 %s736_s10, 4  ;;  %s400_s11 = int_to_ptr.vmem [resolvable:$true] %s399_s11 }
   0x9   :  { %512 = vmatprep.mubr.msk.f32.mxu0 %vm40_vm0, %v24_v5  ;;  %v33_v14 = vld [vmem:[%s911_s0 + $0x58] sm:$0xff]  ;;  %v34_v15 = vld [vmem:[%s911_s0 + $0x60] sm:$0xff]  ;;  %v35_v16 = vld [vmem:[%s911_s0 + $0x68] sm:$0xff]  ;;  %s663_s12 = scalar_lea.vmem %s400_s11, 2048  ;;  %p668_p1 = scmp.lt.s32.totalorder %s400_s11, %s400_s11 }
   0xa   :  { %v36_v17 = vld [vmem:[%s911_s0 + $0x70] sm:$0xff]  ;;  %v37_v18 = vld [vmem:[%s911_s0 + $0x78] sm:$0xff]  ;;  %v250_v45 = vld [vmem:[%s913_s2] sm:$0x3]  ;;  %p664_p0 = scmp.ne.s32.totalorder %s400_s11, %s663_s12  ;;  %p669_p2 = scmp.lt.s32.totalorder %s663_s12, %s663_s12 }
   0xb   :  { %v322_v46 = vld [vmem:[%s914_s3] sm:$0x3] }
   0xc   :  { %513 = vmatmul.mubr.msk.f32.gmra.mrb[2].mxu0 %vm40_vm0, %v25_v6  ;;  %p670_p3 = por %p669_p2, %p668_p1 }
   0xd   :  { %515 = vmatprep.mubr.msk.f32.mxu0 %vm40_vm0, %v26_v7 }
   0xe   :  { %p671_p4 = pnand %p670_p3, %p664_p0 }
  0x10   :  { %516 = vmatmul.mubr.msk.f32.gmra.mrb[4].mxu0 %vm40_vm0, %v27_v8 }
  0x11   :  { %518 = vmatprep.mubr.msk.f32.mxu0 %vm40_vm0, %v28_v9 }
  0x14   :  { %519 = vmatmul.mubr.msk.f32.gmra.mrb[6].mxu0 %vm40_vm0, %v29_v10 }
  0x15   :  { %521 = vmatprep.mubr.msk.f32.mxu0 %vm40_vm0, %v30_v11 }
  0x18   :  { %522 = vmatmul.mubr.msk.f32.gmra.mrb[8].mxu0 %vm40_vm0, %v31_v12 }
  0x19   :  { %524 = vmatprep.mubr.msk.f32.mxu0 %vm40_vm0, %v32_v13 }
  0x1c   :  { %525 = vmatmul.mubr.msk.f32.gmra.mrb[10].mxu0 %vm40_vm0, %v33_v14 }
  0x1d   :  { %527 = vmatprep.mubr.msk.f32.mxu0 %vm40_vm0, %v34_v15 }
  0x20   :  { %528 = vmatmul.mubr.msk.f32.gmra.mrb[12].mxu0 %vm40_vm0, %v35_v16 }
  0x21   :  { %530 = vmatprep.mubr.msk.f32.mxu0 %vm40_vm0, %v36_v17 }
  0x24   :  { %531 = vmatmul.mubr.msk.f32.gmra.mrb[14].mxu0 %vm40_vm0, %v37_v18 }
  0x25   :  { %600 = vmatprep.mubr.msk.f32.mxu0 %vm734_vm1, %v735_v20 }
  0xdb   :  { %v511_v21 = vpop.f32.mrb[0].mxu0 }
  0xdc   :  { %235 = vst [vmem:[#allocation2 + $0x8] sm:$0xff] %v511_v21  ;;  %v155_v22 = vpop.f32.mrb[1].mxu0 }
  0xdd   :  { %234 = vst [vmem:[#allocation2] sm:$0xff] %v155_v22  ;;  %v608_v23 = vpack.c.bf16 %v511_v21, %v155_v22 }
  0xdf   :  { %609 = vmatpush3.bf16.xpose.msra.mxu1 %v608_v23  ;;  %633 = vmatpush3.bf16.xpose.msra.mxu0 %v608_v23  ;;  %v514_v24 = vpop.f32.mrb[2].mxu0 }
  0xe0   :  { %237 = vst [vmem:[#allocation2 + $0x18] sm:$0xff] %v514_v24  ;;  %v165_v25 = vpop.f32.mrb[3].mxu0  ;;  %610 = vmatprep.subr.bf16.mxu1 %v733_v19  ;;  %634 = vmatprep.subr.bf16.mxu0 %v733_v19 }
  0xe1   :  { %236 = vst [vmem:[#allocation2 + $0x10] sm:$0xff] %v165_v25  ;;  %v611_v26 = vpack.c.bf16 %v514_v24, %v165_v25 }
  0xe3   :  { %v517_v27 = vpop.f32.mrb[4].mxu0 }
  0xe4   :  { %239 = vst [vmem:[#allocation2 + $0x28] sm:$0xff] %v517_v27  ;;  %v175_v28 = vpop.f32.mrb[5].mxu0 }
  0xe5   :  { %238 = vst [vmem:[#allocation2 + $0x20] sm:$0xff] %v175_v28  ;;  %v614_v29 = vpack.c.bf16 %v517_v27, %v175_v28 }
  0xe7   :  { %612 = vmatpush3.bf16.xpose.msra.mxu1 %v611_v26  ;;  %636 = vmatpush3.bf16.xpose.msra.mxu0 %v611_v26  ;;  %v520_v30 = vpop.f32.mrb[6].mxu0 }
  0xe8   :  { %613 = vmatprep.subr.bf16.mxu1 %v733_v19  ;;  %637 = vmatprep.subr.bf16.mxu0 %v733_v19  ;;  %241 = vst [vmem:[#allocation2 + $0x38] sm:$0xff] %v520_v30  ;;  %v185_v31 = vpop.f32.mrb[7].mxu0 }
  0xe9   :  { %240 = vst [vmem:[#allocation2 + $0x30] sm:$0xff] %v185_v31  ;;  %v617_v32 = vpack.c.bf16 %v520_v30, %v185_v31 }
  0xeb   :  { %v523_v33 = vpop.f32.mrb[8].mxu0 }
  0xec   :  { %243 = vst [vmem:[#allocation2 + $0x48] sm:$0xff] %v523_v33  ;;  %v195_v34 = vpop.f32.mrb[9].mxu0 }
  0xed   :  { %242 = vst [vmem:[#allocation2 + $0x40] sm:$0xff] %v195_v34  ;;  %v620_v35 = vpack.c.bf16 %v523_v33, %v195_v34 }
  0xef   :  { %615 = vmatpush3.bf16.xpose.msra.mxu1 %v614_v29  ;;  %639 = vmatpush3.bf16.xpose.msra.mxu0 %v614_v29  ;;  %v526_v36 = vpop.f32.mrb[10].mxu0 }
  0xf0   :  { %616 = vmatprep.subr.bf16.mxu1 %v733_v19  ;;  %640 = vmatprep.subr.bf16.mxu0 %v733_v19  ;;  %245 = vst [vmem:[#allocation2 + $0x58] sm:$0xff] %v526_v36  ;;  %v205_v37 = vpop.f32.mrb[11].mxu0 }
  0xf1   :  { %244 = vst [vmem:[#allocation2 + $0x50] sm:$0xff] %v205_v37  ;;  %v623_v38 = vpack.c.bf16 %v526_v36, %v205_v37 }
  0xf3   :  { %v529_v39 = vpop.f32.mrb[12].mxu0 }
  0xf4   :  { %247 = vst [vmem:[#allocation2 + $0x68] sm:$0xff] %v529_v39  ;;  %v215_v40 = vpop.f32.mrb[13].mxu0 }
  0xf5   :  { %246 = vst [vmem:[#allocation2 + $0x60] sm:$0xff] %v215_v40  ;;  %v626_v41 = vpack.c.bf16 %v529_v39, %v215_v40 }
  0xf7   :  { %618 = vmatpush3.bf16.xpose.msra.mxu1 %v617_v32  ;;  %642 = vmatpush3.bf16.xpose.msra.mxu0 %v617_v32  ;;  %v532_v42 = vpop.f32.mrb[14].mxu0 }
  0xf8   :  { %619 = vmatprep.subr.bf16.mxu1 %v733_v19  ;;  %643 = vmatprep.subr.bf16.mxu0 %v733_v19  ;;  %249 = vst [vmem:[#allocation2 + $0x78] sm:$0xff] %v532_v42  ;;  %v225_v43 = vpop.f32.mrb[15].mxu0 }
  0xf9   :  { %248 = vst [vmem:[#allocation2 + $0x70] sm:$0xff] %v225_v43  ;;  %v629_v44 = vpack.c.bf16 %v532_v42, %v225_v43 }
  0xff   :  { %621 = vmatpush3.bf16.xpose.msra.mxu1 %v620_v35  ;;  %645 = vmatpush3.bf16.xpose.msra.mxu0 %v620_v35 }
 0x100   :  { %622 = vmatprep.subr.bf16.mxu1 %v733_v19  ;;  %646 = vmatprep.subr.bf16.mxu0 %v733_v19 }
 0x107   :  { %624 = vmatpush3.bf16.xpose.msra.mxu1 %v623_v38  ;;  %648 = vmatpush3.bf16.xpose.msra.mxu0 %v623_v38 }
 0x108   :  { %625 = vmatprep.subr.bf16.mxu1 %v733_v19  ;;  %649 = vmatprep.subr.bf16.mxu0 %v733_v19 }
 0x10f   :  { %627 = vmatpush3.bf16.xpose.msra.mxu1 %v626_v41  ;;  %651 = vmatpush3.bf16.xpose.msra.mxu0 %v626_v41 }
 0x110   :  { %628 = vmatprep.subr.bf16.mxu1 %v733_v19  ;;  %652 = vmatprep.subr.bf16.mxu0 %v733_v19 }
 0x117   :  { %630 = vmatpush3.bf16.xpose.msra.mxu1 %v629_v44  ;;  %654 = vmatpush3.bf16.xpose.msra.mxu0 %v629_v44 }
 0x11e   :  { %566 = vmatmul.mubr.f32.vlgmr.msra.gmra.mrb[0].mxu1 %v250_v45  ;;  %601 = vmatmul.mubr.f32.vlgmr.msra.gmra.mrb[16].mxu0 %v322_v46 }
 0x11f   :  { %674 = shalt.err (!%p671_p4)
}
 0x120   :  { %s675_s2 = scalar_lea.hbm %s915_s4, 2048 }
 0x121   :  { %p676_p5 = scmp.ne.s32.totalorder %s915_s4, %s675_s2  ;;  %p679_p6 = scmp.lt.u32.totalorder %s675_s2, %s915_s4 }
 0x123   :  { %p681_p7 = pnand %p679_p6, %p676_p5 }
 0x125   :  { %684 = shalt.err (!%p681_p7)
}
 0x126   :  { %s737_s18 = smov 128   ;;  %s738_s19 = smov 8  }
 0x127   :  { %405 = dma.vmem_to_hbm [thread:$0]  %s400_s11, 2048, %s915_s4, [#allocation3], %s737_s18, %s737_s18, %s738_s19  }
 0x128   :  { %s739_s22 = smov [#allocation4]   ;;  %s740_s24 = smov [#allocation6]  }
 0x129   :  { %s412_s23 = sshll.u32 %s739_s22, 4  ;;  %s422_s25 = sshll.u32 %s740_s24, 4  ;;  %s413_s23 = int_to_ptr.vmem [resolvable:$true] %s412_s23  ;;  %s880_s25 = int_to_ptr.vmem [resolvable:$true] %s422_s25 }
 0x12a   :  { %s685_s26 = scalar_lea.vmem %s413_s23, 32  ;;  %p690_p9 = scmp.lt.s32.totalorder %s413_s23, %s413_s23 }
 0x12b   :  { %p686_p8 = scmp.ne.s32.totalorder %s413_s23, %s685_s26  ;;  %p691_p10 = scmp.lt.s32.totalorder %s685_s26, %s685_s26 }
 0x12d   :  { %p692_p11 = por %p691_p10, %p690_p9 }
 0x12f   :  { %p693_p12 = pnand %p692_p11, %p686_p8 }
 0x1f1   :  { %v317_v47 = vpop.f32.mrb[0].mxu1  ;;  %v389_v48 = vpop.f32.mrb[16].mxu0 }
 0x1f2   :  { %321 = vst [vmem:[#allocation4] sm:$0x3] %v317_v47  ;;  %393 = vst [vmem:[#allocation6] sm:$0x3] %v389_v48  ;;  %v567_v49 = vpop.f32.mrb[1].mxu1  ;;  %v602_v50 = vpop.f32.mrb[17].mxu0 }
 0x1f3   :  { %696 = shalt.err (!%p693_p12)
}
 0x1f4   :  { %s697_s28 = scalar_lea.hbm %s916_s5, 32 }
 0x1f5   :  { %p698_p13 = scmp.ne.s32.totalorder %s916_s5, %s697_s28  ;;  %p701_p0 = scmp.lt.u32.totalorder %s697_s28, %s916_s5 }
 0x1f7   :  { %p703_p1 = pnand %p701_p0, %p698_p13 }
 0x1f9   :  { %706 = shalt.err (!%p703_p1)
}
 0x1fa   :  { %415 = dma.vmem_to_hbm [thread:$0]  %s413_s23, 32, %s916_s5, [#allocation5]  }
 0x1fb   :  { %s707_s9 = scalar_lea.vmem %s880_s25, 32  ;;  %p712_p3 = scmp.lt.s32.totalorder %s880_s25, %s880_s25 }
 0x1fc   :  { %p708_p2 = scmp.ne.s32.totalorder %s880_s25, %s707_s9  ;;  %p713_p4 = scmp.lt.s32.totalorder %s707_s9, %s707_s9 }
 0x1fe   :  { %p714_p5 = por %p713_p4, %p712_p3 }
 0x200   :  { %p715_p6 = pnand %p714_p5, %p708_p2 }
 0x202   :  { %718 = shalt.err (!%p715_p6)
}
 0x203   :  { %s719_s12 = scalar_lea.hbm %s917_s6, 32 }
 0x204   :  { %p720_p7 = scmp.ne.s32.totalorder %s917_s6, %s719_s12  ;;  %p723_p8 = scmp.lt.u32.totalorder %s719_s12, %s917_s6 }
 0x206   :  { %p725_p9 = pnand %p723_p8, %p720_p7 }
 0x208   :  { %728 = shalt.err (!%p725_p9)
}
 0x209   :  { %425 = dma.vmem_to_hbm [thread:$0]  %s880_s25, 32, %s917_s6, [#allocation5]  }
 0x20a   :  { %729 = dma.done.wait [#allocation3], 2048  }
 0x20b   :  { %730 = vsyncadd [#allocation3], 4294965248 }
 0x20c   :  { %731 = dma.done.wait [#allocation5], 64  }
 0x20d   :  { %732 = vsyncadd [#allocation5], 4294967232 }
 0x20e   :  { %435 = vsyncpa [#allocation3], 1 }
 0x20f   :  { %436 = vsyncpa [#allocation5], 1 }

</bundles_post_ra>
